<compile_context>
chip_gen: v5e
topology: v5e:2x2
jax: 0.10.0
libtpu: 0.0.40
codegen_flags: <defaults>
</compile_context>

<pallas_src>
import functools

import jax
import jax.numpy as jnp
from jax.experimental import pallas as pl
from jax.experimental.pallas import tpu as pltpu

_MiB = 1024 * 1024
_HEADROOM = 2 * _MiB          # slack inside our own VMEM request
_MAX_BT = 32                  # cap on batches fused per grid step (code size)


def _vmem_budgets():
    """(buffer_budget, request_cap) derived from this generation's VMEM.

    v5e/v6e (128 MiB): ~112 MiB buffer budget / 120 MiB request cap.
    v7x     (64 MiB) :  ~48 MiB buffer budget /  56 MiB request cap.
    """
    try:
        cap = int(pltpu.get_tpu_info().vmem_capacity_bytes)
        if cap <= 0:
            raise ValueError
    except Exception:   # no TPU / older jax: assume the tightest (v7x) budget
        cap = 64 * _MiB
    return cap - 16 * _MiB, cap - 8 * _MiB


def _compiler_params(semantics, needed_bytes, request_cap):
    vmem_limit = int(min(max(needed_bytes, 32 * _MiB), request_cap))
    return pltpu.CompilerParams(dimension_semantics=semantics,
                                vmem_limit_bytes=vmem_limit)


def _weight_bytes(C, Cr, w_dtype):
    # double-buffered 1x1-conv weights + biases
    return 2 * (2 * C * Cr + C + Cr) * jnp.dtype(w_dtype).itemsize


def _pick_bt(B, per_batch_bytes, extra_bytes, budget):
    """Largest divisor of B (<= _MAX_BT) whose double-buffered in+out working
    set fits `budget`, keeping >= 2 grid steps when B >= 2 (megacore balance
    on v7x's two TensorCores).  Returns 0 if even one batch does not fit
    (caller falls back to the two-pass HW-tiled form)."""
    def fits(bt):
        return 4 * bt * per_batch_bytes + extra_bytes <= budget
    if not fits(1):
        return 0
    best = 1
    for bt in range(2, min(B, _MAX_BT) + 1):
        if B % bt == 0 and fits(bt) and B // bt >= 2:
            best = bt
    return best


def _pick_hw_tile(HW, C, itemsize, budget, step, cap):
    """Largest `step`-multiple divisor of HW (<= cap) whose double-buffered
    in+out tiles fit `budget`.  HW is already a multiple of `step`."""
    best = step
    t = step
    limit = min(HW, cap)
    while t <= limit:
        if HW % t == 0 and 4 * C * t * itemsize + _HEADROOM <= budget:
            best = t
        t += step
    return best


# ---------------------------------------------------------------------------
# Fused kernels: one pass over x, Bt batch elements per grid step
# ---------------------------------------------------------------------------

def _se_fused_nchw_kernel(x_ref, wr_ref, br_ref, we_ref, be_ref, o_ref):
    # x/o block: (bt, C, HW) -- C on sublanes, HW on lanes.
    # wr: (Cr, C)  br: (Cr, 1)  we: (C, Cr)  be: (C, 1)
    bt = x_ref.shape[0]
    inv_hw = 1.0 / x_ref.shape[2]
    wr = wr_ref[...]
    we = we_ref[...]
    wdt = wr.dtype
    br = br_ref[...].astype(jnp.float32)
    be = be_ref[...].astype(jnp.float32)
    # Per-batch gate in the C-on-sublanes orientation.  Keeping the gate math
    # 2-D avoids any lane<->sublane relayout of the gate vector; the tiny
    # 1x1-conv matvecs hide under the streaming x DMA.
    for b in range(bt):
        xb = x_ref[b]                                              # (C, HW)
        pooled = jnp.sum(xb, axis=1, keepdims=True,
                         dtype=jnp.float32) * inv_hw               # (C, 1) f32
        h = jnp.dot(wr, pooled.astype(wdt),
                    preferred_element_type=jnp.float32) + br       # (Cr, 1)
        h = jnp.maximum(h, 0.0)
        e = jnp.dot(we, h.astype(wdt),
                    preferred_element_type=jnp.float32) + be       # (C, 1)
        e = jax.nn.sigmoid(e)
        # Second read of x in its native dtype; store is lane-dense when
        # HW % 128 == 0 (masked-tail stores otherwise, still no extra traffic).
        o_ref[b] = (xb * e.astype(xb.dtype)).astype(o_ref.dtype)


def _se_fused_nhwc_kernel(x_ref, wrt_ref, br_ref, wet_ref, be_ref, o_ref):
    # x/o block: (bt, HW, C) -- HW on sublanes, C on lanes (dense if C%128==0).
    # wrt: (C, Cr)  br: (1, Cr)  wet: (Cr, C)  be: (1, C)
    bt = x_ref.shape[0]
    inv_hw = 1.0 / x_ref.shape[1]
    wrt = wrt_ref[...]
    wet = wet_ref[...]
    wdt = wrt.dtype
    br = br_ref[...].astype(jnp.float32)
    be = be_ref[...].astype(jnp.float32)
    for b in range(bt):
        xb = x_ref[b]                                              # (HW, C)
        pooled = jnp.sum(xb, axis=0, keepdims=True,
                         dtype=jnp.float32) * inv_hw               # (1, C) f32
        h = jnp.dot(pooled.astype(wdt), wrt,
                    preferred_element_type=jnp.float32) + br       # (1, Cr)
        h = jnp.maximum(h, 0.0)
        e = jnp.dot(h.astype(wdt), wet,
                    preferred_element_type=jnp.float32) + be       # (1, C)
        e = jax.nn.sigmoid(e)
        o_ref[b] = (xb * e.astype(xb.dtype)).astype(o_ref.dtype)   # lane-dense


# ---------------------------------------------------------------------------
# Two-pass kernels (HW tiled): pool+gate pass, then elementwise scale pass
# ---------------------------------------------------------------------------

def _se_gate_nchw_kernel(x_ref, wr_ref, br_ref, we_ref, be_ref, g_ref, acc_ref,
                         *, inv_hw, n_chunks):
    # x block: (1, C, hw_tile); acc scratch: (C, 128) f32 (lane-dense).
    t = pl.program_id(1)

    @pl.when(t == 0)
    def _():
        acc_ref[...] = jnp.zeros_like(acc_ref)

    # Lane-wise partial sums: pure VPU adds per tile; the single cross-lane
    # (XLU) reduce happens once in the final step.
    xt = x_ref[0]                                                  # (C, hw_tile)
    s = xt[:, 0:128].astype(jnp.float32)
    for c in range(1, n_chunks):
        s = s + xt[:, c * 128:(c + 1) * 128].astype(jnp.float32)
    acc_ref[...] += s

    @pl.when(t == pl.num_programs(1) - 1)
    def _():
        pooled = jnp.sum(acc_ref[...], axis=1, keepdims=True) * inv_hw   # (C, 1)
        wdt = wr_ref.dtype
        h = jnp.dot(wr_ref[...], pooled.astype(wdt),
                    preferred_element_type=jnp.float32) + br_ref[...].astype(jnp.float32)
        h = jnp.maximum(h, 0.0)                                    # (Cr, 1)
        e = jnp.dot(we_ref[...], h.astype(wdt),
                    preferred_element_type=jnp.float32) + be_ref[...].astype(jnp.float32)
        g_ref[0] = jax.nn.sigmoid(e)                               # (C, 1) f32


def _se_gate_nhwc_kernel(x_ref, wrt_ref, br_ref, wet_ref, be_ref, g_ref, acc_ref,
                         *, inv_hw):
    # x block: (1, hw_tile, C); acc scratch: (1, C) f32 (naturally lane-dense).
    t = pl.program_id(1)

    @pl.when(t == 0)
    def _():
        acc_ref[...] = jnp.zeros_like(acc_ref)

    acc_ref[...] += jnp.sum(x_ref[0], axis=0, keepdims=True, dtype=jnp.float32)

    @pl.when(t == pl.num_programs(1) - 1)
    def _():
        pooled = acc_ref[...] * inv_hw                             # (1, C)
        wdt = wrt_ref.dtype
        h = jnp.dot(pooled.astype(wdt), wrt_ref[...],
                    preferred_element_type=jnp.float32) + br_ref[...].astype(jnp.float32)
        h = jnp.maximum(h, 0.0)                                    # (1, Cr)
        e = jnp.dot(h.astype(wdt), wet_ref[...],
                    preferred_element_type=jnp.float32) + be_ref[...].astype(jnp.float32)
        g_ref[0] = jax.nn.sigmoid(e)                               # (1, C) f32


def _se_scale_kernel(x_ref, g_ref, o_ref):
    # NCHW: (1, C, t) * (1, C, 1);  NHWC: (1, t, C) * (1, 1, C).
    o_ref[...] = (x_ref[...] * g_ref[...].astype(x_ref.dtype)).astype(o_ref.dtype)


# ---------------------------------------------------------------------------
# pallas_call wrappers
# ---------------------------------------------------------------------------

def _se_fused_nchw(x3, wr, br2, we, be2, *, bt, req_cap):
    B, C, HW = x3.shape
    Cr = wr.shape[0]
    itemsize = jnp.dtype(x3.dtype).itemsize
    need = 4 * bt * C * HW * itemsize + _weight_bytes(C, Cr, wr.dtype) + _HEADROOM
    cost = pl.CostEstimate(flops=2 * B * C * HW + 4 * B * C * Cr,
                           transcendentals=B * C,
                           bytes_accessed=2 * B * C * HW * itemsize)
    return pl.pallas_call(
        _se_fused_nchw_kernel,
        out_shape=jax.ShapeDtypeStruct((B, C, HW), x3.dtype),
        grid_spec=pltpu.PrefetchScalarGridSpec(
            num_scalar_prefetch=0,
            grid=(B // bt,),
            in_specs=[
                pl.BlockSpec((bt, C, HW), lambda i: (i, 0, 0)),
                pl.BlockSpec((Cr, C), lambda i: (0, 0)),
                pl.BlockSpec((Cr, 1), lambda i: (0, 0)),
                pl.BlockSpec((C, Cr), lambda i: (0, 0)),
                pl.BlockSpec((C, 1), lambda i: (0, 0)),
            ],
            out_specs=pl.BlockSpec((bt, C, HW), lambda i: (i, 0, 0)),
        ),
        compiler_params=_compiler_params(("parallel",), need, req_cap),
        cost_estimate=cost,
    )(x3, wr, br2, we, be2)


def _se_fused_nhwc(x3, wrt, br2, wet, be2, *, bt, req_cap):
    B, HW, C = x3.shape
    Cr = wrt.shape[1]
    itemsize = jnp.dtype(x3.dtype).itemsize
    need = 4 * bt * C * HW * itemsize + _weight_bytes(C, Cr, wrt.dtype) + _HEADROOM
    cost = pl.CostEstimate(flops=2 * B * C * HW + 4 * B * C * Cr,
                           transcendentals=B * C,
                           bytes_accessed=2 * B * C * HW * itemsize)
    return pl.pallas_call(
        _se_fused_nhwc_kernel,
        out_shape=jax.ShapeDtypeStruct((B, HW, C), x3.dtype),
        grid_spec=pltpu.PrefetchScalarGridSpec(
            num_scalar_prefetch=0,
            grid=(B // bt,),
            in_specs=[
                pl.BlockSpec((bt, HW, C), lambda i: (i, 0, 0)),
                pl.BlockSpec((C, Cr), lambda i: (0, 0)),
                pl.BlockSpec((1, Cr), lambda i: (0, 0)),
                pl.BlockSpec((Cr, C), lambda i: (0, 0)),
                pl.BlockSpec((1, C), lambda i: (0, 0)),
            ],
            out_specs=pl.BlockSpec((bt, HW, C), lambda i: (i, 0, 0)),
        ),
        compiler_params=_compiler_params(("parallel",), need, req_cap),
        cost_estimate=cost,
    )(x3, wrt, br2, wet, be2)


def _se_two_pass_nchw(x3, wr, br2, we, be2, *, hw_true, hw_tile, budget, req_cap):
    B, C, HWp = x3.shape
    Cr = wr.shape[0]
    itemsize = jnp.dtype(x3.dtype).itemsize
    if hw_tile is None:
        hw_tile = _pick_hw_tile(HWp, C, itemsize, budget, step=128, cap=1024)
    assert hw_tile % 128 == 0 and HWp % hw_tile == 0, \
        "hw_tile must be a 128-multiple divisor of (padded) H*W"
    n_t = HWp // hw_tile
    n_chunks = hw_tile // 128
    tile_bytes = C * hw_tile * itemsize
    wbytes = _weight_bytes(C, Cr, wr.dtype)

    # Pass 1: per-(batch, channel) gate; HW is the reduction ("arbitrary") axis.
    gate = pl.pallas_call(
        functools.partial(_se_gate_nchw_kernel, inv_hw=1.0 / hw_true,
                          n_chunks=n_chunks),
        out_shape=jax.ShapeDtypeStruct((B, C, 1), jnp.float32),
        grid_spec=pltpu.PrefetchScalarGridSpec(
            num_scalar_prefetch=0,
            grid=(B, n_t),
            in_specs=[
                pl.BlockSpec((1, C, hw_tile), lambda b, t: (b, 0, t)),
                pl.BlockSpec((Cr, C), lambda b, t: (0, 0)),
                pl.BlockSpec((Cr, 1), lambda b, t: (0, 0)),
                pl.BlockSpec((C, Cr), lambda b, t: (0, 0)),
                pl.BlockSpec((C, 1), lambda b, t: (0, 0)),
            ],
            out_specs=pl.BlockSpec((1, C, 1), lambda b, t: (b, 0, 0)),
            scratch_shapes=[pltpu.VMEM((C, 128), jnp.float32)],
        ),
        compiler_params=_compiler_params(
            ("parallel", "arbitrary"),
            2 * tile_bytes + wbytes + C * 128 * 4 + 8 * C + _HEADROOM, req_cap),
        cost_estimate=pl.CostEstimate(
            flops=B * C * HWp + 4 * B * C * Cr, transcendentals=B * C,
            bytes_accessed=B * C * HWp * itemsize),
    )(x3, wr, br2, we, be2)

    # Pass 2: elementwise scale; both axes parallel (keeps both v7x cores fed).
    out = pl.pallas_call(
        _se_scale_kernel,
        out_shape=jax.ShapeDtypeStruct((B, C, HWp), x3.dtype),
        grid_spec=pltpu.PrefetchScalarGridSpec(
            num_scalar_prefetch=0,
            grid=(B, n_t),
            in_specs=[
                pl.BlockSpec((1, C, hw_tile), lambda b, t: (b, 0, t)),
                pl.BlockSpec((1, C, 1), lambda b, t: (b, 0, 0)),
            ],
            out_specs=pl.BlockSpec((1, C, hw_tile), lambda b, t: (b, 0, t)),
        ),
        compiler_params=_compiler_params(
            ("parallel", "parallel"), 4 * tile_bytes + 16 * C + _HEADROOM, req_cap),
        cost_estimate=pl.CostEstimate(
            flops=B * C * HWp, transcendentals=0,
            bytes_accessed=2 * B * C * HWp * itemsize),
    )(x3, gate)
    return out


def _se_two_pass_nhwc(x3, wrt, br2, wet, be2, *, hw_true, hw_tile, budget, req_cap):
    B, HWp, C = x3.shape
    Cr = wrt.shape[1]
    itemsize = jnp.dtype(x3.dtype).itemsize
    if hw_tile is None:
        hw_tile = _pick_hw_tile(HWp, C, itemsize, budget, step=8, cap=1024)
    assert hw_tile % 8 == 0 and HWp % hw_tile == 0, \
        "hw_tile must be an 8-multiple divisor of (padded) H*W"
    n_t = HWp // hw_tile
    tile_bytes = C * hw_tile * itemsize
    wbytes = _weight_bytes(C, Cr, wrt.dtype)

    gate = pl.pallas_call(
        functools.partial(_se_gate_nhwc_kernel, inv_hw=1.0 / hw_true),
        out_shape=jax.ShapeDtypeStruct((B, 1, C), jnp.float32),
        grid_spec=pltpu.PrefetchScalarGridSpec(
            num_scalar_prefetch=0,
            grid=(B, n_t),
            in_specs=[
                pl.BlockSpec((1, hw_tile, C), lambda b, t: (b, t, 0)),
                pl.BlockSpec((C, Cr), lambda b, t: (0, 0)),
                pl.BlockSpec((1, Cr), lambda b, t: (0, 0)),
                pl.BlockSpec((Cr, C), lambda b, t: (0, 0)),
                pl.BlockSpec((1, C), lambda b, t: (0, 0)),
            ],
            out_specs=pl.BlockSpec((1, 1, C), lambda b, t: (b, 0, 0)),
            scratch_shapes=[pltpu.VMEM((1, C), jnp.float32)],
        ),
        compiler_params=_compiler_params(
            ("parallel", "arbitrary"),
            2 * tile_bytes + wbytes + 12 * C + _HEADROOM, req_cap),
        cost_estimate=pl.CostEstimate(
            flops=B * C * HWp + 4 * B * C * Cr, transcendentals=B * C,
            bytes_accessed=B * C * HWp * itemsize),
    )(x3, wrt, br2, wet, be2)

    out = pl.pallas_call(
        _se_scale_kernel,
        out_shape=jax.ShapeDtypeStruct((B, HWp, C), x3.dtype),
        grid_spec=pltpu.PrefetchScalarGridSpec(
            num_scalar_prefetch=0,
            grid=(B, n_t),
            in_specs=[
                pl.BlockSpec((1, hw_tile, C), lambda b, t: (b, t, 0)),
                pl.BlockSpec((1, 1, C), lambda b, t: (b, 0, 0)),
            ],
            out_specs=pl.BlockSpec((1, hw_tile, C), lambda b, t: (b, t, 0)),
        ),
        compiler_params=_compiler_params(
            ("parallel", "parallel"), 4 * tile_bytes + 8 * C + _HEADROOM, req_cap),
        cost_estimate=pl.CostEstimate(
            flops=B * C * HWp, transcendentals=0,
            bytes_accessed=2 * B * C * HWp * itemsize),
    )(x3, gate)
    return out


# ---------------------------------------------------------------------------
# Public entry points
# ---------------------------------------------------------------------------

def se_block(x_nchw, w_reduce, b_reduce, w_expand, b_expand, *,
             force_two_pass=False, hw_tile=None):
    """SEBlock forward, NCHW activations (matches the PyTorch module).

    x_nchw: (B, C, H, W); w_reduce: (Cr, C); b_reduce: (Cr,);
    w_expand: (C, Cr); b_expand: (C,).  Returns (B, C, H, W)."""
    B, C, H, W = x_nchw.shape
    Cr = w_reduce.shape[0]
    HW = H * W
    itemsize = jnp.dtype(x_nchw.dtype).itemsize
    budget, req_cap = _vmem_budgets()

    x3 = x_nchw.reshape(B, C, HW)                 # contiguous reshape: free
    br2 = b_reduce.reshape(Cr, 1)
    be2 = b_expand.reshape(C, 1)

    per_batch = C * HW * itemsize
    extra = _weight_bytes(C, Cr, w_reduce.dtype) + _HEADROOM
    bt = 0 if force_two_pass else _pick_bt(B, per_batch, extra, budget)

    if bt > 0:
        out = _se_fused_nchw(x3, w_reduce, br2, w_expand, be2,
                             bt=bt, req_cap=req_cap)
        return out.reshape(B, C, H, W)

    # Two-pass (HW-tiled) fallback for slabs that don't fit the fused budget.
    # If H*W is not 128-aligned (rare at this size), zero-pad: the pool divides
    # by the true H*W, so the padding does not change the gate.
    hw_pad = (-HW) % 128
    if hw_pad:
        x3 = jnp.pad(x3, ((0, 0), (0, 0), (0, hw_pad)))
    out = _se_two_pass_nchw(x3, w_reduce, br2, w_expand, be2,
                            hw_true=HW, hw_tile=hw_tile,
                            budget=budget, req_cap=req_cap)
    if hw_pad:
        out = out[:, :, :HW]
    return out.reshape(B, C, H, W)


se_block_nchw = se_block


def se_block_nhwc(x_nhwc, w_reduce, b_reduce, w_expand, b_expand, *,
                  force_two_pass=False, hw_tile=None):
    """SEBlock forward, channels-last activations (B, H, W, C).

    Same weights as the NCHW entry (w_reduce: (Cr, C), w_expand: (C, Cr)).
    The activation slab is never transposed in HBM: C stays on lanes."""
    B, H, W, C = x_nhwc.shape
    Cr = w_reduce.shape[0]
    HW = H * W
    itemsize = jnp.dtype(x_nhwc.dtype).itemsize
    budget, req_cap = _vmem_budgets()

    x3 = x_nhwc.reshape(B, HW, C)                 # contiguous reshape: free
    wrt = jnp.transpose(w_reduce)                 # (C, Cr) -- tiny, not the slab
    wet = jnp.transpose(w_expand)                 # (Cr, C)
    br2 = b_reduce.reshape(1, Cr)
    be2 = b_expand.reshape(1, C)

    per_batch = C * HW * itemsize
    extra = _weight_bytes(C, Cr, w_reduce.dtype) + _HEADROOM
    bt = 0 if force_two_pass else _pick_bt(B, per_batch, extra, budget)

    if bt > 0:
        out = _se_fused_nhwc(x3, wrt, br2, wet, be2, bt=bt, req_cap=req_cap)
        return out.reshape(B, H, W, C)

    hw_pad = (-HW) % 8
    if hw_pad:
        x3 = jnp.pad(x3, ((0, 0), (0, hw_pad), (0, 0)))
    out = _se_two_pass_nhwc(x3, wrt, br2, wet, be2,
                            hw_true=HW, hw_tile=hw_tile,
                            budget=budget, req_cap=req_cap)
    if hw_pad:
        out = out[:, :HW, :]
    return out.reshape(B, H, W, C)


def se_block_ref(x, w_reduce, b_reduce, w_expand, b_expand):
    """Pure-JAX reference (f32 math) matching the PyTorch forward (NCHW)."""
    xf = x.astype(jnp.float32)
    pooled = jnp.mean(xf, axis=(2, 3))                                  # (B, C)
    h = jnp.maximum(pooled @ w_reduce.astype(jnp.float32).T
                    + b_reduce.astype(jnp.float32), 0.0)                # (B, Cr)
    e = jax.nn.sigmoid(h @ w_expand.astype(jnp.float32).T
                       + b_expand.astype(jnp.float32))                  # (B, C)
    return xf * e[:, :, None, None]


if __name__ == "__main__":
    key = jax.random.PRNGKey(0)

    def make_case(k, B, C, H, W, rd_ratio=0.0625, dtype=jnp.float32):
        Cr = max(1, int(C * rd_ratio))
        kx, kwr, kbr, kwe, kbe = jax.random.split(k, 5)
        x = jax.random.normal(kx, (B, C, H, W), dtype=jnp.float32).astype(dtype)
        w_reduce = (jax.random.normal(kwr, (Cr, C), dtype=jnp.float32)
                    * (1.0 / C) ** 0.5).astype(dtype)
        b_reduce = (jax.random.normal(kbr, (Cr,), dtype=jnp.float32) * 0.1).astype(dtype)
        w_expand = (jax.random.normal(kwe, (C, Cr), dtype=jnp.float32)
                    * (1.0 / Cr) ** 0.5).astype(dtype)
        b_expand = (jax.random.normal(kbe, (C,), dtype=jnp.float32) * 0.1).astype(dtype)
        return x, w_reduce, b_reduce, w_expand, b_expand

    def check(out, ref, atol, rtol, msg):
        assert out.shape == ref.shape, msg
        assert jnp.allclose(out.astype(jnp.float32), ref, atol=atol, rtol=rtol), msg

    k1, k2, k3, k4, k5 = jax.random.split(key, 5)

    # 1) NCHW fused, lane-dense H*W (early-stage shape).
    a1 = make_case(k1, B=2, C=64, H=16, W=16)
    o1 = jax.block_until_ready(se_block(*a1))
    check(o1, se_block_ref(*a1), 1e-5, 1e-5, "fused NCHW (HW dense)")

    # 2) NCHW fused, late-stage shape (7x7, C=128), B=4 -> Bt=2 per grid step.
    a2 = make_case(k2, B=4, C=128, H=7, W=7)
    o2 = jax.block_until_ready(se_block(*a2))
    check(o2, se_block_ref(*a2), 1e-5, 1e-5, "fused NCHW (7x7, Bt>1)")

    # 3) NCHW two-pass fallback (forced): multi-tile reduction, lane-chunked acc.
    a3 = make_case(k3, B=2, C=64, H=16, W=32)
    o3 = jax.block_until_ready(se_block(*a3, force_two_pass=True, hw_tile=256))
    check(o3, se_block_ref(*a3), 1e-5, 1e-5, "two-pass NCHW")

    # 4) NHWC entry point (channels-last, no wrapper transposes), fused.
    x4, wr4, br4, we4, be4 = make_case(k4, B=2, C=128, H=7, W=7)
    x4_nhwc = jnp.transpose(x4, (0, 2, 3, 1))        # test-only layout change
    ref4 = jnp.transpose(se_block_ref(x4, wr4, br4, we4, be4), (0, 2, 3, 1))
    o4 = jax.block_until_ready(se_block_nhwc(x4_nhwc, wr4, br4, we4, be4))
    check(o4, ref4, 1e-5, 1e-5, "fused NHWC")

    # 5) NHWC two-pass fallback (forced), padded HW (49 -> 56), 8-row tiles.
    o5 = jax.block_until_ready(se_block_nhwc(x4_nhwc, wr4, br4, we4, be4,
                                             force_two_pass=True, hw_tile=8))
    check(o5, ref4, 1e-5, 1e-5, "two-pass NHWC")

    # 6) bf16 NCHW fused (bf16 gate/multiply -> looser tolerance vs f32 ref).
    a6 = make_case(k5, B=2, C=64, H=16, W=16, dtype=jnp.bfloat16)
    o6 = jax.block_until_ready(se_block(*a6))
    check(o6, se_block_ref(*a6), 5e-2, 5e-2, "fused NCHW bf16")

    print("KERNEL_OK")
</pallas_src>

<mosaic_0001>
module attributes {stable_mosaic.version = 11 : i64} {
  func.func @_se_fused_nchw_kernel(%arg0: i32, %arg1: memref<1x64x256xf32, #tpu.memory_space<vmem>>, %arg2: memref<4x64xf32, #tpu.memory_space<vmem>>, %arg3: memref<4x1xf32, #tpu.memory_space<vmem>>, %arg4: memref<64x4xf32, #tpu.memory_space<vmem>>, %arg5: memref<64x1xf32, #tpu.memory_space<vmem>>, %arg6: memref<1x64x256xf32, #tpu.memory_space<vmem>>) attributes {dimension_semantics = [#tpu.dimension_semantics<parallel>], iteration_bounds = array<i64: 2>, scalar_prefetch = 0 : i64, scratch_operands = 0 : i64, tpu.core_type = #tpu.core_type<tc>, window_params = [{transform_indices = @transform_0, window_bounds = array<i64: 1, 64, 256>}, {pipeline_mode = #tpu.pipeline_mode<synchronous>, transform_indices = @transform_1, window_bounds = array<i64: 4, 64>}, {pipeline_mode = #tpu.pipeline_mode<synchronous>, transform_indices = @transform_2, window_bounds = array<i64: 4, 1>}, {pipeline_mode = #tpu.pipeline_mode<synchronous>, transform_indices = @transform_3, window_bounds = array<i64: 64, 4>}, {pipeline_mode = #tpu.pipeline_mode<synchronous>, transform_indices = @transform_4, window_bounds = array<i64: 64, 1>}, {transform_indices = @transform_5, window_bounds = array<i64: 1, 64, 256>}]} {
    %c0 = arith.constant 0 : index
    %c0_0 = arith.constant 0 : index
    %0 = vector.load %arg2[%c0, %c0_0] : memref<4x64xf32, #tpu.memory_space<vmem>>, vector<4x64xf32>
    %c0_1 = arith.constant 0 : index
    %c0_2 = arith.constant 0 : index
    %1 = vector.load %arg4[%c0_1, %c0_2] : memref<64x4xf32, #tpu.memory_space<vmem>>, vector<64x4xf32>
    %c0_3 = arith.constant 0 : index
    %c0_4 = arith.constant 0 : index
    %2 = vector.load %arg3[%c0_3, %c0_4] : memref<4x1xf32, #tpu.memory_space<vmem>>, vector<4x1xf32>
    %c0_5 = arith.constant 0 : index
    %c0_6 = arith.constant 0 : index
    %3 = vector.load %arg5[%c0_5, %c0_6] : memref<64x1xf32, #tpu.memory_space<vmem>>, vector<64x1xf32>
    %c0_7 = arith.constant 0 : index
    %c0_8 = arith.constant 0 : index
    %c0_9 = arith.constant 0 : index
    %4 = vector.load %arg1[%c0_7, %c0_8, %c0_9] : memref<1x64x256xf32, #tpu.memory_space<vmem>>, vector<1x64x256xf32>
    %5 = vector.shape_cast %4 : vector<1x64x256xf32> to vector<64x256xf32>
    %cst = arith.constant dense<0.000000e+00> : vector<64xf32>
    %6 = vector.multi_reduction <add>, %5, %cst [1] : vector<64x256xf32> to vector<64xf32>
    %7 = vector.shape_cast %6 : vector<64xf32> to vector<64x1xf32>
    %cst_10 = arith.constant 3.906250e-03 : f32
    %8 = vector.broadcast %cst_10 : f32 to vector<64x1xf32>
    %9 = arith.mulf %7, %8 : vector<64x1xf32>
    %cst_11 = arith.constant dense<0.000000e+00> : vector<4x1xf32>
    %10 = tpu.matmul %0, %9, %cst_11 {dimension_numbers = #tpu.dot_dimension_numbers<[1], [0], [0], [1], [0, 0, 1, 1], [], []>} : vector<4x64xf32>, vector<64x1xf32>, vector<4x1xf32> -> vector<4x1xf32>
    %11 = arith.addf %10, %2 : vector<4x1xf32>
    %cst_12 = arith.constant 0.000000e+00 : f32
    %12 = vector.broadcast %cst_12 : f32 to vector<4x1xf32>
    %13 = arith.maximumf %11, %12 : vector<4x1xf32>
    %cst_13 = arith.constant dense<0.000000e+00> : vector<64x1xf32>
    %14 = tpu.matmul %1, %13, %cst_13 {dimension_numbers = #tpu.dot_dimension_numbers<[1], [0], [0], [1], [0, 0, 1, 1], [], []>} : vector<64x4xf32>, vector<4x1xf32>, vector<64x1xf32> -> vector<64x1xf32>
    %15 = arith.addf %14, %3 : vector<64x1xf32>
    %16 = arith.negf %15 : vector<64x1xf32>
    %17 = math.exp %16 : vector<64x1xf32>
    %cst_14 = arith.constant 1.000000e+00 : f32
    %18 = vector.broadcast %cst_14 : f32 to vector<64x1xf32>
    %19 = arith.addf %18, %17 : vector<64x1xf32>
    %20 = arith.divf %18, %19 : vector<64x1xf32>
    %21 = vector.broadcast %20 : vector<64x1xf32> to vector<64x256xf32>
    %22 = arith.mulf %5, %21 : vector<64x256xf32>
    %c0_15 = arith.constant 0 : index
    %c0_16 = arith.constant 0 : index
    %c0_17 = arith.constant 0 : index
    %23 = vector.load %arg6[%c0_15, %c0_16, %c0_17] : memref<1x64x256xf32, #tpu.memory_space<vmem>>, vector<1x64x256xf32>
    %24 = vector.shape_cast %23 : vector<1x64x256xf32> to vector<64x256xf32>
    %25 = vector.shape_cast %22 : vector<64x256xf32> to vector<1x64x256xf32>
    tpu.vector_store %arg6[%c0_15, %c0_16, %c0_17], %25 {strides = array<i32>} : memref<1x64x256xf32, #tpu.memory_space<vmem>>, vector<1x64x256xf32>,
    return
  }
  func.func @transform_0(%arg0: i32) -> (i32, i32, i32) {
    %c0_i32 = arith.constant 0 : i32
    %c0_i32_0 = arith.constant 0 : i32
    %c0_i32_1 = arith.constant 0 : i32
    return %arg0, %c0_i32, %c0_i32_0 : i32, i32, i32
  }
  func.func @transform_1(%arg0: i32) -> (i32, i32) {
    %c0_i32 = arith.constant 0 : i32
    %c0_i32_0 = arith.constant 0 : i32
    %c0_i32_1 = arith.constant 0 : i32
    return %c0_i32, %c0_i32_0 : i32, i32
  }
  func.func @transform_2(%arg0: i32) -> (i32, i32) {
    %c0_i32 = arith.constant 0 : i32
    %c0_i32_0 = arith.constant 0 : i32
    %c0_i32_1 = arith.constant 0 : i32
    return %c0_i32, %c0_i32_0 : i32, i32
  }
  func.func @transform_3(%arg0: i32) -> (i32, i32) {
    %c0_i32 = arith.constant 0 : i32
    %c0_i32_0 = arith.constant 0 : i32
    %c0_i32_1 = arith.constant 0 : i32
    return %c0_i32, %c0_i32_0 : i32, i32
  }
  func.func @transform_4(%arg0: i32) -> (i32, i32) {
    %c0_i32 = arith.constant 0 : i32
    %c0_i32_0 = arith.constant 0 : i32
    %c0_i32_1 = arith.constant 0 : i32
    return %c0_i32, %c0_i32_0 : i32, i32
  }
  func.func @transform_5(%arg0: i32) -> (i32, i32, i32) {
    %c0_i32 = arith.constant 0 : i32
    %c0_i32_0 = arith.constant 0 : i32
    %c0_i32_1 = arith.constant 0 : i32
    return %arg0, %c0_i32, %c0_i32_0 : i32, i32, i32
  }
}

</mosaic_0001>

<bundles_post_ra>
// kernel: tpu_custom_call.1
= control target key start
LH: loop header
LB: loop body
LE: loop exit
PB: predicated region body
PF: predicated region fallthrough
CT: control target
= control target key end

     0   :  { %10 = vsyncpa [#allocation3], 0  ;;  %s1314_s0 = inlined_call_operand.hbm [shape: f32[2,64,256], index: 0, kind: input, shape index: {}]   ;;  %s1315_s1 = inlined_call_operand.vmem [shape: f32[4,64], index: 1, kind: input, shape index: {}]   ;;  %s1316_s2 = inlined_call_operand.vmem [shape: f32[4,1], index: 2, kind: input, shape index: {}]   ;;  %s1317_s3 = inlined_call_operand.vmem [shape: f32[64,4], index: 3, kind: input, shape index: {}]   ;;  %s1318_s4 = inlined_call_operand.vmem [shape: f32[64,1], index: 4, kind: input, shape index: {}]   ;;  %s1319_s5 = inlined_call_operand.hbm [shape: f32[2,64,256], index: 5, kind: output, shape index: {}]  }
   0x1   :  { %12 = vsyncpa [#allocation3 + $0x1], 0 }
   0x2   :  { %13 = vsyncpa [#allocation4], 0 }
   0x3   :  { %15 = vsyncpa [#allocation4 + $0x1], 0  ;;  %s974_s18 = smov 0   ;;  %s976_s19 = smov 0  }
   0x4   :  { %s978_s20 = smov 0   ;;  %s980_s21 = smov 0  }
   0x5 LB: > { %s995_s22 = sadd.s32 4294967295, %s937_s21   ;;  %s719_s23 = sadd.s32 4294967294, %s937_s21   ;;  %s937_s21 = sphi %s980_s21, %s1331_s21   ;;  %s933_s20 = sphi %s978_s20, %s1330_s20   ;;  %s929_s19 = sphi %s976_s19, %s1329_s19   ;;  %s925_s18 = sphi %s974_s18, %s1328_s18  }
   0x6   : > { %s999_s24 = sadd.s32 1, %s937_s21   ;;  %s28_s25 = sadd.s32 1, %s933_s20 }
   0x7   : > { %s25_s26 = ssub.s32 %s937_s21, %s999_s24  ;;  %p35_p0 = scmp.ne.s32.totalorder %s933_s20, %s929_s19 }
   0x8   : > { %p26_p1 = scmp.eq.s32.totalorder %s25_s26, 0  ;;  %p36_p2 = scmp.eq.s32.totalorder %s937_s21, 0 }
   0x9   : > { %p41_p3 = scmp.ne.s32.totalorder %s929_s19, %s925_s18  ;;  %p42_p4 = scmp.eq.s32.totalorder %s995_s22, 0 }
   0xa   : > { %s1011_s27 = scalar_select %p26_p1, %s933_s20, %s28_s25  }
   0xb   : > { %p1013_p5 = por %p36_p2, %p35_p0  ;;  %p1017_p6 = por %p42_p4, %p41_p3 }
   0xc   : > { %p149_p7 = scmp.eq.s32.totalorder %s995_s22, 1  ;;  %p155_p8 = scmp.eq.s32.totalorder %s719_s23, 1 }
   0xd   : > { %p767_p10 = scmp.lt.s32.totalorder %s937_s21, 2  ;;  %s187_s7 = sand.u32 1, %s933_s20  }
   0xe   : > { %p1024_p11 = por %p149_p7, %p35_p0  ;;  %p1028_p12 = por %p155_p8, %p41_p3 }
   0xf   : > { %s751_s8 = sshll.u32 %s937_s21, 7  ;;  %s722_s9 = sshll.u32 %s187_s7, 7 }
  0x10   : > { %s196_s12 = scalar_lea.hbm %s1314_s0, %s751_s8  ;;  %s191_s14 = scalar_lea.vmem [#allocation2], %s722_s9 }
  0x11   : > { %s197_s13 = sshll.u32 %s196_s12, 4  ;;  %s199_s15 = sshll.u32 %s191_s14, 4  ;;  %s198_s13 = int_to_ptr.hbm [resolvable:$true] %s197_s13  ;;  %s200_s15 = int_to_ptr.vmem [resolvable:$true] %s199_s15 }
  0x12   : > { %p1039_p13 = pnand %p767_p10, %p1013_p5  ;;  %p725_p0 = scmp.ge.s32.totalorder %s937_s21, 1 }
  0x13   : > { %p207_p1 = scmp.lt.s32.totalorder %s937_s21, 3  ;;  %s188_s17 = scalar_lea.sflag [#allocation3], %s187_s7 }
  0x14   : > { %s841_s23 = sshra.s32 %s198_s13, 4  ;;  %p845_p3 = pneg %p1039_p13  ;;  %s842_s23 = int_to_ptr.hbm [resolvable:$true] %s841_s23 }
  0x15   : > { %s843_s25 = scalar_lea.hbm %s842_s23, 128  ;;  %s848_s28 = scalar_lea.hbm %s1314_s0, 256 }
  0x16   : > { %p844_p2 = scmp.ne.s32.totalorder %s842_s23, %s843_s25  ;;  %p849_p5 = scmp.lt.s32.totalorder %s842_s23, %s1314_s0 }
  0x17   : > { %p850_p8 = scmp.lt.s32.totalorder %s848_s28, %s843_s25 }
  0x18   : > { %p846_p4 = pnand %p845_p3, %p844_p2 }
  0x19   : > { %p851_p10 = por %p850_p8, %p849_p5 }
  0x1a   : > { %p847_p7 = pneg %p846_p4 }
  0x1c   : > { %p852_p9 = pnand %p851_p10, %p847_p7 }
  0x1e   : > { %855 = shalt.err (!%p852_p9)
}
  0x1f   : > { %s939_s7 = smov 256   ;;  %s940_s11 = smov 16  }
  0x20   : > { %762 = dma.hbm_to_vmem [thread:$0]  (!%p1039_p13), %s198_s13, 2048, %s200_s15, %s188_s17, %s939_s7, %s939_s7, %s940_s11  }
  0x21   : > { %p208_p2 = pnand %p725_p0, %p207_p1 }
  0x22   : > { %s1060_s12 = sand.u32 (!%p208_p2), 1, %s929_s19  }
  0x23   : > { %211 = sbr.rel (%p208_p2) target bundleno = 626 (0x272), region = 40  ;;  %s726_s14 = sshll.u32 (!%p208_p2), %s1060_s12, 7 }
  0x24   : > { %s214_s23 = scalar_lea.sflag (!%p208_p2), [#allocation3], %s1060_s12  ;;  %s217_s25 = scalar_lea.vmem (!%p208_p2), [#allocation2], %s726_s14 }
  0x28   : > { %916 = dma.done.wait (%p1017_p6), %s214_s23, 2048  }
  0x29   : > { %918 = vsyncadd (%p1017_p6), %s214_s23, 4294965248  ;;  %v1070_v0 = vld [vmem:[%s217_s25 + $0x70] sm:$0xff]  ;;  %v1072_v1 = vld [vmem:[%s217_s25 + $0x78] sm:$0xff]  ;;  %vm311_vm0 = vcmask 523264   ;;  %vm361_vm1 = vcmask 1043456   ;;  %vm336_vm2 = vcmask 31744  }
  0x2a   : > { %v1074_v2 = vld [vmem:[%s217_s25 + $0x50] sm:$0xff]  ;;  %v300_v3 = vadd.f32 %v1072_v1, %v1070_v0  ;;  %v1078_v4 = vld [vmem:[%s217_s25 + $0x58] sm:$0xff]  ;;  %v1088_v9 = vld [vmem:[%s217_s25 + $0x60] sm:$0xff]  ;;  %v941_v55 = vmov 0   ;;  %s1248_s9 = scalar_lea.vmem [#allocation5], %s726_s14  ;;  %s752_s14 = sshll.u32 %s995_s22, 7 }
  0x2b   : > { %v294_v5 = vadd.f32 %v1078_v4, %v1074_v2  ;;  %v1082_v6 = vld [vmem:[%s217_s25 + $0x30] sm:$0xff]  ;;  %v1084_v7 = vld [vmem:[%s217_s25 + $0x38] sm:$0xff]  ;;  %v1090_v10 = vld [vmem:[%s217_s25 + $0x68] sm:$0xff]  ;;  %806 = vset.pattern.permute.xlu2 %v941_v55  ;;  %807 = vset.pattern.permute.xlu0 %v941_v55  ;;  %s642_s11 = scalar_lea.hbm %s1319_s5, %s752_s14  ;;  %s643_s23 = sshll.u32 %s1248_s9, 4  ;;  %s644_s23 = int_to_ptr.vmem [resolvable:$true] %s643_s23 }
  0x2c   : > { %301 = vadd.xlane.f32.xlu0 %v300_v3  ;;  %v288_v8 = vadd.f32 %v1084_v7, %v1082_v6  ;;  %v1092_v11 = vld [vmem:[%s217_s25 + $0x40] sm:$0xff]  ;;  %v1094_v12 = vld [vmem:[%s217_s25 + $0x48] sm:$0xff]  ;;  %v297_v15 = vadd.f32 %v1090_v10, %v1088_v9  ;;  %v1106_v18 = vld [vmem:[%s217_s25 + $0x10] sm:$0xff]  ;;  %808 = vset.pattern.permute.xlu1 %v941_v55  ;;  %s631_s22 = scalar_lea.sflag [#allocation4], %s1060_s12  ;;  %s891_s17 = scalar_lea.hbm %s1319_s5, 256 }
  0x2d   : > { %295 = vadd.xlane.f32.xlu1 %v294_v5  ;;  %v1096_v13 = vld [vmem:[%s217_s25 + $0x20] sm:$0xff]  ;;  %v1098_v14 = vld [vmem:[%s217_s25 + $0x28] sm:$0xff]  ;;  %v291_v16 = vadd.f32 %v1094_v12, %v1092_v11  ;;  %v1108_v19 = vld [vmem:[%s217_s25 + $0x18] sm:$0xff] }
  0x2e   : > { %289 = vadd.xlane.f32.xlu2 %v288_v8  ;;  %v285_v17 = vadd.f32 %v1098_v14, %v1096_v13  ;;  %v1110_v20 = vld [vmem:[%s217_s25] sm:$0xff]  ;;  %v1112_v21 = vld [vmem:[%s217_s25 + $0x8] sm:$0xff]  ;;  %v282_v22 = vadd.f32 %v1108_v19, %v1106_v18  ;;  %v249_v46 = vld [vmem:[%s1317_s3 + $0x18] sm:$0xff]  ;;  %s645_s25 = sshll.u32 %s642_s11, 4  ;;  %s646_s25 = int_to_ptr.hbm [resolvable:$true] %s645_s25 }
  0x2f   : > { %v279_v23 = vadd.f32 %v1112_v21, %v1110_v20  ;;  %v245_v40 = vld [vmem:[%s1315_s1] sm:$0xf]  ;;  %v252_v47 = vld [vmem:[%s1317_s3 + $0x30] sm:$0xff]  ;;  %v247_v48 = vld [vmem:[%s1317_s3 + $0x8] sm:$0xff]  ;;  %s885_s29 = sshra.s32 %s646_s25, 4  ;;  %s886_s29 = int_to_ptr.hbm [resolvable:$true] %s885_s29 }
  0x30   : > { %v254_v41 = vld [vmem:[%s1316_s2] sm:$0xf]  ;;  %v253_v50 = vld [vmem:[%s1317_s3 + $0x38] sm:$0xff]  ;;  %v248_v51 = vld [vmem:[%s1317_s3 + $0x10] sm:$0xff]  ;;  %s887_s13 = scalar_lea.hbm %s886_s29, 128  ;;  %p892_p0 = scmp.lt.s32.totalorder %s886_s29, %s1319_s5 }
  0x31   : > { %v246_v45 = vld [vmem:[%s1317_s3] sm:$0xff]  ;;  %v251_v52 = vld [vmem:[%s1317_s3 + $0x28] sm:$0xff]  ;;  %v258_v58 = vld [vmem:[%s1318_s4 + $0x18] sm:$0xff]  ;;  %p888_p6 = scmp.ne.s32.totalorder %s886_s29, %s887_s13  ;;  %p893_p1 = scmp.lt.s32.totalorder %s891_s17, %s887_s13 }
  0x32   : > { %v250_v49 = vld [vmem:[%s1317_s3 + $0x20] sm:$0xff]  ;;  %v261_v59 = vld [vmem:[%s1318_s4 + $0x30] sm:$0xff]  ;;  %v256_v60 = vld [vmem:[%s1318_s4 + $0x8] sm:$0xff] }
  0x33   : > { %v255_v53 = vld [vmem:[%s1318_s4] sm:$0xff]  ;;  %p889_p9 = pnand %p888_p6, %p1024_p11  ;;  %p894_p3 = por %p893_p1, %p892_p0 }
  0x34   : > { %298 = vadd.xlane.f32.xlu0 %v297_v15 }
  0x35   : > { %292 = vadd.xlane.f32.xlu1 %v291_v16  ;;  %p890_p13 = pneg %p889_p9 }
  0x36   : > { %286 = vadd.xlane.f32.xlu2 %v285_v17 }
  0x37   : > { %p895_p4 = pnand %p894_p3, %p890_p13 }
  0x3c   : > { %283 = vadd.xlane.f32.xlu0 %v282_v22 }
  0x3d   : > { %280 = vadd.xlane.f32.xlu1 %v279_v23 }
  0x9f   : > { %v302_v24 = vpop.xlane.xlu0 %301 }
  0xa0   : > { %v310_v25 = vmul.f32 0.00390625, %v302_v24  ;;  %v296_v26 = vpop.xlane.xlu1 %295  ;;  %v259_v24 = vld [vmem:[%s1318_s4 + $0x20] sm:$0xff] }
  0xa1   : > { %v290_v27 = vpop.xlane.xlu2 %289  ;;  %v308_v31 = vmul.f32 0.00390625, %v296_v26  ;;  %v262_v26 = vld [vmem:[%s1318_s4 + $0x38] sm:$0xff] }
  0xa2   : > { %323 = vmatpush.msra.mxu0 %v310_v25  ;;  %v306_v34 = vmul.f32 0.00390625, %v290_v27  ;;  %v257_v25 = vld [vmem:[%s1318_s4 + $0x10] sm:$0xff] }
  0xa7   : > { %v299_v28 = vpop.xlane.xlu0 %298 }
  0xa8   : > { %v309_v29 = vmul.f32 0.00390625, %v299_v28  ;;  %v293_v30 = vpop.xlane.xlu1 %292 }
  0xa9   : > { %v307_v32 = vmul.f32 0.00390625, %v293_v30  ;;  %v287_v33 = vpop.xlane.xlu2 %286 }
  0xaa   : > { %324 = vmatpush.msra.mxu0 %v309_v29  ;;  %v305_v35 = vmul.f32 0.00390625, %v287_v33 }
  0xac   : > { %325 = vmatpush.msra.mxu0 %v308_v31 }
  0xae   : > { %326 = vmatpush.msra.mxu0 %v307_v32 }
  0xaf   : > { %v284_v36 = vpop.xlane.xlu0 %283 }
  0xb0   : > { %327 = vmatpush.msra.mxu0 %v306_v34  ;;  %v304_v37 = vmul.f32 0.00390625, %v284_v36  ;;  %v281_v38 = vpop.xlane.xlu1 %280 }
  0xb1   : > { %v303_v39 = vmul.f32 0.00390625, %v281_v38 }
  0xb2   : > { %328 = vmatpush.msra.mxu0 %v305_v35 }
  0xb4   : > { %329 = vmatpush.msra.mxu0 %v304_v37 }
  0xb6   : > { %330 = vmatpush.msra.mxu0 %v303_v39 }
  0xb7   : > { %728 = vmatmul.msk.f32.vlgmr.msra.gmra.mxu0 %vm311_vm0, %v245_v40 }
 0x134   : > { %v332_v42 = vpop.f32.mrf.mxu0 }
 0x135   : > { %v333_v43 = vadd.f32 %v332_v42, %v254_v41  ;;  %v260_v42 = vld [vmem:[%s1318_s4 + $0x28] sm:$0xff] }
 0x137   : > { %v335_v44 = vmax.f32 %v333_v43, 0.0 }
 0x139   : > { %729 = vmatpush.msk.msra.mxu1 %vm361_vm1, %v335_v44  ;;  %753 = vmatpush.msk.msra.mxu2 %vm361_vm1, %v335_v44 }
 0x13a   : > { %754 = vmatpush.msk.msra.mxu3 %vm361_vm1, %v335_v44  ;;  %730 = vmatmul.msk.f32.vlgmr.msra.gmra.mxu1 %vm336_vm2, %v246_v45 }
 0x13b   : > { %733 = vmatmul.msk.f32.vlgmr.msra.gmra.mxu2 %vm336_vm2, %v249_v46  ;;  %736 = vmatmul.msk.f32.vlgmr.msra.gmra.mxu3 %vm336_vm2, %v252_v47 }
 0x142   : > { %731 = vmatmul.msk.f32.gmra.mxu1 %vm336_vm2, %v247_v48 }
 0x143   : > { %734 = vmatmul.msk.f32.gmra.mxu2 %vm336_vm2, %v250_v49  ;;  %737 = vmatmul.msk.f32.gmra.mxu3 %vm336_vm2, %v253_v50 }
 0x14a   : > { %732 = vmatmul.msk.f32.gmra.mxu1 %vm336_vm2, %v248_v51 }
 0x14b   : > { %735 = vmatmul.msk.f32.gmra.mxu2 %vm336_vm2, %v251_v52 }
 0x1b7   : > { %v382_v54 = vpop.f32.mrf.mxu1 }
 0x1b8   : > { %v383_v56 = vadd.f32 %v382_v54, %v255_v53 }
 0x1ba   : > { %v738_v57 = vmul.f32 -1.442695, %v383_v56 }
 0x1bc   : > { %809 = vpow2.f32 %v738_v57 }
 0x1be   : > { %v391_v61 = vpop.f32.mrf.mxu2  ;;  %v400_v62 = vpop.f32.mrf.mxu3 }
 0x1bf   : > { %v392_v63 = vadd.f32 %v391_v61, %v258_v58  ;;  %v385_v3 = vpop.f32.mrf.mxu1  ;;  %v401_v5 = vadd.f32 %v400_v62, %v261_v59 }
 0x1c0   : > { %v386_v8 = vadd.f32 %v385_v3, %v256_v60 }
 0x1c1   : > { %v741_v15 = vmul.f32 -1.442695, %v392_v63  ;;  %v744_v22 = vmul.f32 -1.442695, %v401_v5 }
 0x1c2   : > { %v810_v16 = vpop.eup %809  ;;  %v739_v17 = vmul.f32 -1.442695, %v386_v8 }
 0x1c3   : > { %v430_v23 = vadd.f32 1.0, %v810_v16  ;;  %811 = vpow2.f32 %v741_v15 }
 0x1c4   : > { %813 = vpow2.f32 %v739_v17 }
 0x1c5   : > { %815 = vrcp.f32 %v430_v23  ;;  %v449_v48 = vand.u32 2147483648, %v430_v23  ;;  %v447_v50 = vand.u32 2147483647, %v430_v23  ;;  %vm443_vm4 = vweird.f32 %v430_v23 }
 0x1c6   : > { %817 = vpow2.f32 %v744_v22  ;;  %v394_v27 = vpop.f32.mrf.mxu2  ;;  %v403_v28 = vpop.f32.mrf.mxu3 }
 0x1c7   : > { %v395_v29 = vadd.f32 %v394_v27, %v259_v24  ;;  %v388_v30 = vpop.f32.mrf.mxu1  ;;  %v404_v32 = vadd.f32 %v403_v28, %v262_v26  ;;  %v450_v57 = vor.u32 1.1754944e-38, %v449_v48  ;;  %vm448_vm6 = vcmp.eq.f32.partialorder %v447_v50, 8.507059e+37 }
 0x1c8   : > { %v389_v31 = vadd.f32 %v388_v30, %v257_v25 }
 0x1c9   : > { %v812_v33 = vpop.eup %811  ;;  %v742_v34 = vmul.f32 -1.442695, %v395_v29  ;;  %v745_v41 = vmul.f32 -1.442695, %v404_v32 }
 0x1ca   : > { %v814_v35 = vpop.eup %813  ;;  %v1177_v36 = vadd.f32 1.0, %v812_v33  ;;  %v740_v37 = vmul.f32 -1.442695, %v389_v31 }
 0x1cb   : > { %v816_v38 = vpop.eup %815  ;;  %v1179_v39 = vadd.f32 1.0, %v814_v35  ;;  %819 = vpow2.f32 %v742_v34 }
 0x1cc   : > { %v818_v40 = vpop.eup %817  ;;  %821 = vrcp.f32 %v1177_v36  ;;  %v439_v43 = vmul.f32 %v816_v38, %v430_v23  ;;  %vm444_vm3 = vweird.f32 %v816_v38  ;;  %v494_v16 = vand.u32 2147483648, %v1177_v36 }
 0x1cd   : > { %823 = vrcp.f32 %v1179_v39  ;;  %v1186_v44 = vadd.f32 1.0, %v818_v40  ;;  %vm445_vm5 = vmor %vm443_vm4, %vm444_vm3  ;;  %v464_v15 = vand.u32 2147483648, %v1179_v39  ;;  %v462_v25 = vand.u32 2147483647, %v1179_v39 }
 0x1ce   : > { %825 = vpow2.f32 %v740_v37  ;;  %v397_v45 = vpop.f32.mrf.mxu2  ;;  %v440_v46 = vsub.f32 1.0, %v439_v43  ;;  %v492_v26 = vand.u32 2147483647, %v1177_v36  ;;  %vm458_vm9 = vweird.f32 %v1179_v39 }
 0x1cf   : > { %v398_v47 = vadd.f32 %v397_v45, %v260_v42  ;;  %827 = vpow2.f32 %v745_v41  ;;  %vm488_vm10 = vweird.f32 %v1177_v36  ;;  %v465_v32 = vor.u32 1.1754944e-38, %v464_v15 }
 0x1d0   : > { %v441_v49 = vmul.f32 %v816_v38, %v440_v46  ;;  %829 = vrcp.f32 %v1186_v44  ;;  %v495_v35 = vor.u32 1.1754944e-38, %v494_v16  ;;  %vm463_vm13 = vcmp.eq.f32.partialorder %v462_v25, 8.507059e+37 }
 0x1d1   : > { %v820_v51 = vpop.eup %819  ;;  %v743_v52 = vmul.f32 -1.442695, %v398_v47  ;;  %vm493_vm14 = vcmp.eq.f32.partialorder %v492_v26, 8.507059e+37  ;;  %vm533_vm1 = vweird.f32 %v1186_v44  ;;  %v537_v15 = vand.u32 2147483647, %v1186_v44 }
 0x1d2   : > { %v822_v53 = vpop.eup %821  ;;  %v1189_v54 = vadd.f32 1.0, %v820_v51  ;;  %v442_v55 = vadd.f32 %v816_v38, %v441_v49 }
 0x1d3   : > { %v824_v56 = vpop.eup %823  ;;  %831 = vpow2.f32 %v743_v52  ;;  %v484_v58 = vmul.f32 %v822_v53, %v1177_v36  ;;  %vm489_vm7 = vweird.f32 %v822_v53 }
 0x1d4   : > { %v826_v59 = vpop.eup %825  ;;  %833 = vrcp.f32 %v1189_v54  ;;  %v446_v60 = vsel %vm445_vm5, %v816_v38, %v442_v55  ;;  %v454_v61 = vmul.f32 %v824_v56, %v1179_v39  ;;  %vm459_vm8 = vweird.f32 %v824_v56  ;;  %vm490_vm11 = vmor %vm488_vm10, %vm489_vm7 }
 0x1d5   : > { %v1194_v62 = vadd.f32 1.0, %v826_v59  ;;  %v451_v63 = vsel %vm448_vm6, %v450_v57, %v446_v60  ;;  %v485_v3 = vsub.f32 1.0, %v484_v58  ;;  %v828_v5 = vpop.eup %827  ;;  %vm460_vm12 = vmor %vm458_vm9, %vm459_vm8  ;;  %v509_v46 = vand.u32 2147483648, %v1189_v54 }
 0x1d6   : > { %560 = vperm.xlu2 %806, %v451_v63   ;;  %v455_v8 = vsub.f32 1.0, %v454_v61  ;;  %v1198_v17 = vpop.eup %829  ;;  %v1201_v22 = vadd.f32 1.0, %v828_v5  ;;  %v507_v48 = vand.u32 2147483647, %v1189_v54  ;;  %vm503_vm0 = vweird.f32 %v1189_v54 }
 0x1d7   : > { %835 = vrcp.f32 %v1194_v62  ;;  %v486_v23 = vmul.f32 %v822_v53, %v485_v3  ;;  %v529_v33 = vmul.f32 %v1198_v17, %v1186_v44  ;;  %v479_v50 = vand.u32 2147483648, %v1194_v62 }
 0x1d8   : > { %v456_v24 = vmul.f32 %v824_v56, %v455_v8  ;;  %837 = vrcp.f32 %v1201_v22  ;;  %v477_v55 = vand.u32 2147483647, %v1194_v62  ;;  %vm473_vm4 = vweird.f32 %v1194_v62 }
 0x1d9   : > { %v832_v27 = vpop.eup %831  ;;  %v487_v28 = vadd.f32 %v822_v53, %v486_v23  ;;  %v530_v43 = vsub.f32 1.0, %v529_v33  ;;  %v510_v58 = vor.u32 1.1754944e-38, %v509_v46  ;;  %vm508_vm5 = vcmp.eq.f32.partialorder %v507_v48, 8.507059e+37 }
 0x1da   : > { %v834_v29 = vpop.eup %833  ;;  %v1207_v30 = vadd.f32 1.0, %v832_v27  ;;  %v457_v31 = vadd.f32 %v824_v56, %v456_v24  ;;  %vm534_vm6 = vweird.f32 %v1198_v17  ;;  %v480_v61 = vor.u32 1.1754944e-38, %v479_v50 }
 0x1db   : > { %v491_v34 = vsel %vm490_vm11, %v822_v53, %v487_v28  ;;  %v499_v37 = vmul.f32 %v834_v29, %v1189_v54  ;;  %vm504_vm15 = vweird.f32 %v834_v29  ;;  %v539_v5 = vand.u32 2147483648, %v1186_v44  ;;  %vm1231_vm9 = vmor %vm533_vm1, %vm534_vm6 }
 0x1dc   : > { %839 = vrcp.f32 %v1207_v30  ;;  %v461_v38 = vsel %vm460_vm12, %v824_v56, %v457_v31  ;;  %v496_v40 = vsel %vm493_vm14, %v495_v35, %v491_v34  ;;  %vm505_vm3 = vmor %vm503_vm0, %vm504_vm15  ;;  %v531_v56 = vmul.f32 %v1198_v17, %v530_v43 }
 0x1dd   : > { %v836_v36 = vpop.eup %835  ;;  %v466_v39 = vsel %vm463_vm13, %v465_v32, %v461_v38  ;;  %v500_v41 = vsub.f32 1.0, %v499_v37  ;;  %vm478_vm8 = vcmp.eq.f32.partialorder %v477_v55, 8.507059e+37  ;;  %v524_v27 = vand.u32 2147483648, %v1207_v30 }
 0x1de   : > { %565 = vperm.xlu0 %807, %v466_v39   ;;  %575 = vperm.xlu2 %806, %v496_v40   ;;  %v469_v42 = vmul.f32 %v836_v36, %v1194_v62  ;;  %v838_v49 = vpop.eup %837  ;;  %vm474_vm2 = vweird.f32 %v836_v36  ;;  %v532_v62 = vadd.f32 %v1198_v17, %v531_v56  ;;  %v540_v28 = vor.u32 1.1754944e-38, %v539_v5 }
 0x1df   : > { %v501_v45 = vmul.f32 %v834_v29, %v500_v41  ;;  %v544_v54 = vmul.f32 %v838_v49, %v1201_v22  ;;  %vm475_vm7 = vmor %vm473_vm4, %vm474_vm2  ;;  %vm518_vm11 = vweird.f32 %v1207_v30  ;;  %vm538_vm12 = vcmp.eq.f32.partialorder %v537_v15, 8.507059e+37 }
 0x1e0   : > { %v470_v47 = vsub.f32 1.0, %v469_v42  ;;  %v536_v31 = vsel %vm1231_vm9, %v1198_v17, %v532_v62  ;;  %v525_v33 = vor.u32 1.1754944e-38, %v524_v27  ;;  %vm548_vm15 = vweird.f32 %v1201_v22 }
 0x1e1   : > { %v502_v51 = vadd.f32 %v834_v29, %v501_v45  ;;  %v545_v25 = vsub.f32 1.0, %v544_v54  ;;  %v541_v34 = vsel %vm538_vm12, %v540_v28, %v536_v31  ;;  %vm549_vm0 = vweird.f32 %v838_v49 }
 0x1e2   : > { %v840_v52 = vpop.eup %839  ;;  %v471_v53 = vmul.f32 %v836_v36, %v470_v47  ;;  %v554_v37 = vand.u32 2147483648, %v1201_v22  ;;  %v552_v38 = vand.u32 2147483647, %v1201_v22  ;;  %vm550_vm1 = vmor %vm548_vm15, %vm549_vm0 }
 0x1e3   : > { %v506_v57 = vsel %vm505_vm3, %v834_v29, %v502_v51  ;;  %v514_v59 = vmul.f32 %v840_v52, %v1207_v30  ;;  %vm519_vm10 = vweird.f32 %v840_v52  ;;  %v522_v29 = vand.u32 2147483647, %v1207_v30 }
 0x1e4   : > { %v472_v60 = vadd.f32 %v836_v36, %v471_v53  ;;  %v511_v63 = vsel %vm508_vm5, %v510_v58, %v506_v57  ;;  %vm520_vm13 = vmor %vm518_vm11, %vm519_vm10  ;;  %v546_v32 = vmul.f32 %v838_v49, %v545_v25  ;;  %v555_v17 = vor.u32 1.1754944e-38, %v554_v37 }
 0x1e5   : > { %v515_v3 = vsub.f32 1.0, %v514_v59  ;;  %vm523_vm14 = vcmp.eq.f32.partialorder %v522_v29, 8.507059e+37  ;;  %vm553_vm2 = vcmp.eq.f32.partialorder %v552_v38, 8.507059e+37 }
 0x1e6   : > { %v476_v8 = vsel %vm475_vm7, %v836_v36, %v472_v60  ;;  %580 = vperm.xlu2 %806, %v511_v63   ;;  %v547_v30 = vadd.f32 %v838_v49, %v546_v32 }
 0x1e7   : > { %v481_v16 = vsel %vm478_vm8, %v480_v61, %v476_v8  ;;  %v516_v23 = vmul.f32 %v840_v52, %v515_v3 }
 0x1e8   : > { %570 = vperm.xlu1 %808, %v481_v16   ;;  %v551_v36 = vsel %vm550_vm1, %v838_v49, %v547_v30 }
 0x1e9   : > { %v517_v26 = vadd.f32 %v840_v52, %v516_v23  ;;  %v556_v39 = vsel %vm553_vm2, %v555_v17, %v551_v36 }
 0x1eb   : > { %v521_v44 = vsel %vm520_vm13, %v840_v52, %v517_v26 }
 0x1ec   : > { %v526_v35 = vsel %vm523_vm14, %v525_v33, %v521_v44 }
 0x1ee   : > { %590 = vperm.xlu2 %806, %v541_v34  }
 0x1f0   : > { %585 = vperm.xlu1 %808, %v526_v35  }
 0x1f8   : > { %595 = vperm.xlu1 %808, %v556_v39  }
 0x230   : > { %v561_v40 = vpop.permute.xlu2 %560 }
 0x231   : > { %v598_v41 = vmul.f32 %v561_v40, %v1110_v20  ;;  %v599_v42 = vmul.f32 %v561_v40, %v1112_v21 }
 0x233   : > { %614 = vst [vmem:[%s1248_s9] sm:$0xff] %v598_v41 }
 0x234   : > { %615 = vst [vmem:[%s1248_s9 + $0x8] sm:$0xff] %v599_v42 }
 0x238   : > { %v576_v22 = vpop.permute.xlu2 %575 }
 0x239   : > { %v604_v43 = vmul.f32 %v576_v22, %v1082_v6  ;;  %v605_v20 = vmul.f32 %v576_v22, %v1084_v7 }
 0x23b   : > { %620 = vst [vmem:[%s1248_s9 + $0x30] sm:$0xff] %v604_v43 }
 0x23c   : > { %621 = vst [vmem:[%s1248_s9 + $0x38] sm:$0xff] %v605_v20 }
 0x240   : > { %v581_v21 = vpop.permute.xlu2 %580 }
 0x241   : > { %v606_v45 = vmul.f32 %v581_v21, %v1092_v11  ;;  %v607_v46 = vmul.f32 %v581_v21, %v1094_v12 }
 0x243   : > { %622 = vst [vmem:[%s1248_s9 + $0x40] sm:$0xff] %v606_v45 }
 0x244   : > { %623 = vst [vmem:[%s1248_s9 + $0x48] sm:$0xff] %v607_v46 }
 0x248   : > { %v591_v47 = vpop.permute.xlu2 %590 }
 0x249   : > { %v610_v48 = vmul.f32 %v591_v47, %v1088_v9  ;;  %v611_v6 = vmul.f32 %v591_v47, %v1090_v10 }
 0x24b   : > { %626 = vst [vmem:[%s1248_s9 + $0x60] sm:$0xff] %v610_v48 }
 0x24c   : > { %627 = vst [vmem:[%s1248_s9 + $0x68] sm:$0xff] %v611_v6 }
 0x250   : > { %v566_v7 = vpop.permute.xlu0 %565 }
 0x251   : > { %v600_v49 = vmul.f32 %v566_v7, %v1106_v18  ;;  %v601_v11 = vmul.f32 %v566_v7, %v1108_v19 }
 0x253   : > { %616 = vst [vmem:[%s1248_s9 + $0x10] sm:$0xff] %v600_v49 }
 0x254   : > { %617 = vst [vmem:[%s1248_s9 + $0x18] sm:$0xff] %v601_v11 }
 0x25a   : > { %v571_v12 = vpop.permute.xlu1 %570 }
 0x25b   : > { %v602_v50 = vmul.f32 %v571_v12, %v1096_v13  ;;  %v603_v51 = vmul.f32 %v571_v12, %v1098_v14 }
 0x25d   : > { %618 = vst [vmem:[%s1248_s9 + $0x20] sm:$0xff] %v602_v50 }
 0x25e   : > { %619 = vst [vmem:[%s1248_s9 + $0x28] sm:$0xff] %v603_v51 }
 0x262   : > { %v586_v9 = vpop.permute.xlu1 %585 }
 0x263   : > { %v608_v10 = vmul.f32 %v586_v9, %v1074_v2  ;;  %v609_v18 = vmul.f32 %v586_v9, %v1078_v4 }
 0x265   : > { %624 = vst [vmem:[%s1248_s9 + $0x50] sm:$0xff] %v608_v10 }
 0x266   : > { %625 = vst [vmem:[%s1248_s9 + $0x58] sm:$0xff] %v609_v18 }
 0x26a   : > { %v596_v13 = vpop.permute.xlu1 %595 }
 0x26b   : > { %v612_v14 = vmul.f32 %v596_v13, %v1070_v0  ;;  %v613_v19 = vmul.f32 %v596_v13, %v1072_v1 }
 0x26d   : > { %628 = vst [vmem:[%s1248_s9 + $0x70] sm:$0xff] %v612_v14 }
 0x26e   : > { %629 = vst [vmem:[%s1248_s9 + $0x78] sm:$0xff] %v613_v19 }
 0x26f   : > { %898 = shalt.err (!%p895_p4)
}
 0x270   : > { %s942_s12 = smov 256   ;;  %s943_s28 = smov 16  }
 0x271   : > { %757 = dma.vmem_to_hbm [thread:$0]  (%p1024_p11), %s644_s23, 2048, %s646_s25, %s631_s22, %s942_s12, %s942_s12, %s943_s28  }
 0x272 PF: > { %s660_s9 = sand.u32 1, %s925_s18   ;;  %p1327_p7 = scmp.ge.s32.totalorder %s937_s21, 2 }
 0x273   : > { %s661_s14 = scalar_lea.sflag [#allocation4], %s660_s9 }
 0x274   : > { %p764_p5 = pnand %p1327_p7, %p1028_p12 }
 0x276   : > { %p765_p8 = pneg %p764_p5 }
 0x278   : > { %920 = dma.done.wait (%p765_p8), %s661_s14, 2048  }
 0x279   : > { %922 = vsyncadd (%p765_p8), %s661_s14, 4294965248  ;;  %p18_p10 = scmp.ge.s32.totalorder %s999_s24, 4   ;;  %s1328_s18 = smov %s929_s19 }
 0x27a   : > { %s1329_s19 = smov %s933_s20  ;;  %s1330_s20 = smov %s1011_s27 }
 0x27b   : > { %s1331_s21 = smov %s999_s24  ;;  %20 = sbr.rel (!%p18_p10) target bundleno = 5 (0x5), region = 85 }
 0x280   :  { %667 = vsyncpa [#allocation3], 1 }
 0x281   :  { %669 = vsyncpa [#allocation3 + $0x1], 1 }
 0x282   :  { %670 = vsyncpa [#allocation4], 1 }
 0x283   :  { %672 = vsyncpa [#allocation4 + $0x1], 1 }

</bundles_post_ra>
